<compile_context>
chip_gen: v6e
topology: v6e:2x2x1
jax: 0.10.0
libtpu: 0.0.40
codegen_flags: <defaults>
</compile_context>

<pallas_src>
import functools

import jax
import jax.numpy as jnp
from jax import lax
from jax.experimental import pallas as pl
from jax.experimental.pallas import tpu as pltpu

_VMEM_LIMIT = 32 * 1024 * 1024   # <= physical / scoped-safe on v5e, v6e and v7x
_CONV_HALO = 8                   # sublane-aligned carried halo rows (>= d_conv - 1)


# --------------------------------------------------------------------------- utilities
def _pick_tile(dim, target, align):
    """Largest tile <= target that is a multiple of `align` and divides `dim`.
    Falls back to the full dimension (always legal for BlockSpec)."""
    if dim <= target:
        return dim
    t = (target // align) * align
    while t >= align:
        if dim % t == 0:
            return t
        t -= align
    return dim


def _pick_time_chunk(L, target):
    """Time chunk for the scan: multiple of 128 (lane-dense B/C blocks) or full L."""
    if L <= target:
        return L
    t = (target // 128) * 128
    while t >= 128:
        if L % t == 0:
            return t
        t -= 128
    return L    # fallback: whole sequence resident (rare, non-128-divisible L)


# ----------------------------------------------------------------------------- matmuls
def _matmul_kernel(a_ref, b_ref, o_ref, acc_ref):
    @pl.when(pl.program_id(2) == 0)
    def _init():
        acc_ref[...] = jnp.zeros_like(acc_ref)

    acc_ref[...] += jnp.dot(a_ref[...], b_ref[...],
                            preferred_element_type=jnp.float32)

    @pl.when(pl.program_id(2) == pl.num_programs(2) - 1)
    def _done():
        o_ref[...] = acc_ref[...].astype(o_ref.dtype)


def matmul(a, b, out_dtype=jnp.bfloat16, *, tm=512, tn=512, tk=512):
    """Tiled (M,K) @ (K,N); bf16 operands welcome, fp32 accumulation."""
    M, K = a.shape
    K2, N = b.shape
    assert K == K2
    tm = _pick_tile(M, tm, 8)
    tn = _pick_tile(N, tn, 128)
    tk = _pick_tile(K, tk, 128)
    return pl.pallas_call(
        _matmul_kernel,
        out_shape=jax.ShapeDtypeStruct((M, N), out_dtype),
        grid=(M // tm, N // tn, K // tk),
        in_specs=[
            pl.BlockSpec((tm, tk), lambda i, j, k: (i, k)),
            pl.BlockSpec((tk, tn), lambda i, j, k: (k, j)),
        ],
        out_specs=pl.BlockSpec((tm, tn), lambda i, j, k: (i, j)),
        scratch_shapes=[pltpu.VMEM((tm, tn), jnp.float32)],
        compiler_params=pltpu.CompilerParams(
            dimension_semantics=("parallel", "parallel", "arbitrary"),
            vmem_limit_bytes=_VMEM_LIMIT),
    )(a, b)


def _matmul2_kernel(a_ref, b1_ref, b2_ref, o1_ref, o2_ref, acc1_ref, acc2_ref):
    @pl.when(pl.program_id(2) == 0)
    def _init():
        acc1_ref[...] = jnp.zeros_like(acc1_ref)
        acc2_ref[...] = jnp.zeros_like(acc2_ref)

    a = a_ref[...]
    acc1_ref[...] += jnp.dot(a, b1_ref[...], preferred_element_type=jnp.float32)
    acc2_ref[...] += jnp.dot(a, b2_ref[...], preferred_element_type=jnp.float32)

    @pl.when(pl.program_id(2) == pl.num_programs(2) - 1)
    def _done():
        o1_ref[...] = acc1_ref[...].astype(o1_ref.dtype)
        o2_ref[...] = acc2_ref[...].astype(o2_ref.dtype)


def matmul2(a, b1, b2, out_dtype=jnp.bfloat16, *, tm=512, tn=512, tk=512):
    """One pass over `a` against two same-shaped weights (fused in_proj x / z)."""
    M, K = a.shape
    K2, N = b1.shape
    assert K == K2 and b2.shape == b1.shape
    tm = _pick_tile(M, tm, 8)
    tn = _pick_tile(N, tn, 128)
    tk = _pick_tile(K, tk, 128)
    return pl.pallas_call(
        _matmul2_kernel,
        out_shape=(jax.ShapeDtypeStruct((M, N), out_dtype),
                   jax.ShapeDtypeStruct((M, N), out_dtype)),
        grid=(M // tm, N // tn, K // tk),
        in_specs=[
            pl.BlockSpec((tm, tk), lambda i, j, k: (i, k)),
            pl.BlockSpec((tk, tn), lambda i, j, k: (k, j)),
            pl.BlockSpec((tk, tn), lambda i, j, k: (k, j)),
        ],
        out_specs=(pl.BlockSpec((tm, tn), lambda i, j, k: (i, j)),
                   pl.BlockSpec((tm, tn), lambda i, j, k: (i, j))),
        scratch_shapes=[pltpu.VMEM((tm, tn), jnp.float32),
                        pltpu.VMEM((tm, tn), jnp.float32)],
        compiler_params=pltpu.CompilerParams(
            dimension_semantics=("parallel", "parallel", "arbitrary"),
            vmem_limit_bytes=_VMEM_LIMIT),
    )(a, b1, b2)


# ------------------------------------------------------------------ fused x_proj (dt/B/C)
def _xproj_kernel(a_ref, wdt_ref, wb_ref, wc_ref, dt_ref, b_ref, c_ref,
                  accdt_ref, accb_ref, accc_ref):
    @pl.when(pl.program_id(1) == 0)
    def _init():
        accdt_ref[...] = jnp.zeros_like(accdt_ref)
        accb_ref[...] = jnp.zeros_like(accb_ref)
        accc_ref[...] = jnp.zeros_like(accc_ref)

    a = a_ref[...]
    accdt_ref[...] += jnp.dot(a, wdt_ref[...], preferred_element_type=jnp.float32)
    accb_ref[...] += jnp.dot(a, wb_ref[...], preferred_element_type=jnp.float32)
    accc_ref[...] += jnp.dot(a, wc_ref[...], preferred_element_type=jnp.float32)

    @pl.when(pl.program_id(1) == pl.num_programs(1) - 1)
    def _done():
        dt_ref[...] = accdt_ref[...].astype(dt_ref.dtype)
        b_ref[...] = accb_ref[...].astype(b_ref.dtype)
        c_ref[...] = accc_ref[...].astype(c_ref.dtype)


def xproj(a, w_dt, w_b, w_c, *, tm=512, tk=512):
    """x_proj split into dt / B / C outputs in one pass over the activations."""
    M, K = a.shape
    dt_rank = w_dt.shape[1]
    d_state = w_b.shape[1]
    tm = _pick_tile(M, tm, 8)
    tk = _pick_tile(K, tk, 128)
    return pl.pallas_call(
        _xproj_kernel,
        out_shape=(jax.ShapeDtypeStruct((M, dt_rank), jnp.bfloat16),
                   jax.ShapeDtypeStruct((M, d_state), jnp.float32),
                   jax.ShapeDtypeStruct((M, d_state), jnp.float32)),
        grid=(M // tm, K // tk),
        in_specs=[
            pl.BlockSpec((tm, tk), lambda i, k: (i, k)),
            pl.BlockSpec((tk, dt_rank), lambda i, k: (k, 0)),
            pl.BlockSpec((tk, d_state), lambda i, k: (k, 0)),
            pl.BlockSpec((tk, d_state), lambda i, k: (k, 0)),
        ],
        out_specs=(pl.BlockSpec((tm, dt_rank), lambda i, k: (i, 0)),
                   pl.BlockSpec((tm, d_state), lambda i, k: (i, 0)),
                   pl.BlockSpec((tm, d_state), lambda i, k: (i, 0))),
        scratch_shapes=[pltpu.VMEM((tm, dt_rank), jnp.float32),
                        pltpu.VMEM((tm, d_state), jnp.float32),
                        pltpu.VMEM((tm, d_state), jnp.float32)],
        compiler_params=pltpu.CompilerParams(
            dimension_semantics=("parallel", "arbitrary"),
            vmem_limit_bytes=_VMEM_LIMIT),
    )(a, w_dt, w_b, w_c)


# ------------------------------------------------------------------- residual + RMSNorm
def _add_rmsnorm_kernel(x_ref, res_ref, w_ref, normed_ref, resout_ref, *, eps):
    r = x_ref[0].astype(jnp.float32) + res_ref[0].astype(jnp.float32)   # (cL, D) fp32
    var = jnp.mean(r * r, axis=-1, keepdims=True)
    normed = r * lax.rsqrt(var + eps) * w_ref[...].astype(jnp.float32)
    normed_ref[0] = normed.astype(normed_ref.dtype)                     # bf16 out
    resout_ref[0] = r                                                   # fp32 residual


def add_rmsnorm(x, res, w, eps=1e-5, *, chunk_l=None):
    B, L, D = x.shape
    if chunk_l is None:
        # keep per-block fp32/bf16 traffic ~<= 4 MiB so all three generations pipeline
        chunk_l = max(8, min(512, (4 * 1024 * 1024) // (12 * max(D, 1))))
    cl = _pick_tile(L, chunk_l, 8)
    kernel = functools.partial(_add_rmsnorm_kernel, eps=eps)
    return pl.pallas_call(
        kernel,
        out_shape=(
            jax.ShapeDtypeStruct((B, L, D), jnp.bfloat16),   # normed (feeds bf16 matmuls)
            jax.ShapeDtypeStruct((B, L, D), jnp.float32),    # residual_in_fp32
        ),
        grid=(B, L // cl),
        in_specs=[
            pl.BlockSpec((1, cl, D), lambda b, l: (b, l, 0)),
            pl.BlockSpec((1, cl, D), lambda b, l: (b, l, 0)),
            pl.BlockSpec((1, D), lambda b, l: (0, 0)),
        ],
        out_specs=(
            pl.BlockSpec((1, cl, D), lambda b, l: (b, l, 0)),
            pl.BlockSpec((1, cl, D), lambda b, l: (b, l, 0)),
        ),
        compiler_params=pltpu.CompilerParams(
            dimension_semantics=("parallel", "parallel"),
            vmem_limit_bytes=_VMEM_LIMIT),
    )(x, res, w)


# --------------------------------------------------------- depthwise causal conv + SiLU
def _conv_silu_kernel(x_ref, w_ref, b_ref, o_ref, ext_scr, *, d_conv, chunk_l):
    f32 = jnp.float32

    @pl.when(pl.program_id(2) == 0)
    def _init():                                         # zero halo at the first chunk
        ext_scr[0:_CONV_HALO, :] = jnp.zeros((_CONV_HALO, ext_scr.shape[1]), f32)

    x = x_ref[0].astype(f32)                             # (cl, td)
    ext_scr[_CONV_HALO:_CONV_HALO + chunk_l, :] = x      # rows [HALO, HALO+cl) = this chunk

    acc = jnp.zeros_like(x)
    for k in range(d_conv):                              # static taps
        s = d_conv - 1 - k                               # causal delay of tap k
        if s == 0:
            xk = x
        else:
            xk = ext_scr[_CONV_HALO - s:_CONV_HALO - s + chunk_l, :]
        acc = acc + xk * w_ref[k:k + 1, :].astype(f32)
    acc = acc + b_ref[...].astype(f32)

    # carry the trailing HALO rows of the stream for the next time chunk
    ext_scr[0:_CONV_HALO, :] = ext_scr[chunk_l:chunk_l + _CONV_HALO, :]

    o_ref[0] = (acc * jax.nn.sigmoid(acc)).astype(o_ref.dtype)          # SiLU


def conv1d_silu(x, w, b, *, tile_d=512, chunk_l=256):
    B, L, d_inner = x.shape
    d_conv = w.shape[0]
    assert d_conv - 1 <= _CONV_HALO
    td = _pick_tile(d_inner, tile_d, 128)
    cl = _pick_tile(L, chunk_l, 8)
    kernel = functools.partial(_conv_silu_kernel, d_conv=d_conv, chunk_l=cl)
    return pl.pallas_call(
        kernel,
        out_shape=jax.ShapeDtypeStruct((B, L, d_inner), jnp.bfloat16),
        grid=(B, d_inner // td, L // cl),                # time chunks innermost
        in_specs=[
            pl.BlockSpec((1, cl, td), lambda b, d, t: (b, t, d)),
            pl.BlockSpec((d_conv, td), lambda b, d, t: (0, d)),
            pl.BlockSpec((1, td), lambda b, d, t: (0, d)),
        ],
        out_specs=pl.BlockSpec((1, cl, td), lambda b, d, t: (b, t, d)),
        scratch_shapes=[pltpu.VMEM((_CONV_HALO + cl, td), jnp.float32)],
        compiler_params=pltpu.CompilerParams(
            dimension_semantics=("parallel", "parallel", "arbitrary"),
            vmem_limit_bytes=_VMEM_LIMIT),
    )(x, w, b)


# -------------------------------------------------------------- selective SSM scan kernel
def _ssm_scan_kernel(x_ref, dtin_ref, bt_ref, ct_ref, z_ref,
                     wdt_ref, dtb_ref, aneg_ref, d_ref,
                     y_ref,
                     dt_scr, dtx_scr, y_scr, h_scr,
                     *, chunk_l, unroll):
    f32 = jnp.float32

    # running state h persists across time chunks; reset at the first chunk of each (b, d)
    @pl.when(pl.program_id(2) == 0)
    def _reset():
        h_scr[...] = jnp.zeros_like(h_scr)

    x = x_ref[0].astype(f32)                          # (cl, td)   u (post conv+silu)
    a_neg = aneg_ref[...]                             # (S, td)    = -exp(A_log)^T

    # fused dt_proj (+bias, softplus w/ threshold 20), bf16 MXU dot, f32 accumulate
    dt_raw = jnp.dot(dtin_ref[0], wdt_ref[...],
                     preferred_element_type=f32) + dtb_ref[...]         # (cl, td)
    dt = jnp.where(dt_raw > 20.0, dt_raw,
                   jnp.log1p(jnp.exp(jnp.minimum(dt_raw, 20.0))))
    dt_scr[...] = dt
    dtx_scr[...] = dt * x

    bt = bt_ref[0]                                    # (S, cl)   d_state on sublanes
    ct = ct_ref[0]                                    # (S, cl)   time on lanes
    col = lax.broadcasted_iota(jnp.int32, bt.shape, 1)

    def body(t, h):
        onehot = col == t
        b_t = jnp.sum(jnp.where(onehot, bt, 0.0), axis=1, keepdims=True)   # (S, 1)
        c_t = jnp.sum(jnp.where(onehot, ct, 0.0), axis=1, keepdims=True)   # (S, 1)
        dt_row = dt_scr[pl.ds(t, 1), :]               # (1, td)
        dtx_row = dtx_scr[pl.ds(t, 1), :]             # (1, td)
        da = jnp.exp(dt_row * a_neg)                  # (S, td)  exp on EUP, per step
        h = da * h + dtx_row * b_t                    # (S, td)  carried in vregs
        y_scr[pl.ds(t, 1), :] = jnp.sum(c_t * h, axis=0, keepdims=True)
        return h

    h_fin = lax.fori_loop(0, chunk_l, body, h_scr[...], unroll=unroll)
    h_scr[...] = h_fin                                # persist once per chunk

    z = z_ref[0].astype(f32)
    y = y_scr[...] + x * d_ref[...]                   # D * u skip
    y = y * (z * jax.nn.sigmoid(z))                   # gate with silu(z)
    y_ref[0] = y.astype(y_ref.dtype)


def ssm_scan(x, dt_in, b_t, c_t, z, a_neg, d_skip, dt_bias, w_dt,
             *, chunk_l=128, tile_d=512):
    B, L, d_inner = x.shape
    d_state = b_t.shape[1]
    dt_rank = dt_in.shape[-1]
    cl = _pick_time_chunk(L, chunk_l)
    td = _pick_tile(d_inner, tile_d, 128)
    unroll = 4 if cl % 4 == 0 else 1
    kernel = functools.partial(_ssm_scan_kernel, chunk_l=cl, unroll=unroll)
    return pl.pallas_call(
        kernel,
        out_shape=jax.ShapeDtypeStruct((B, L, d_inner), jnp.bfloat16),
        grid=(B, d_inner // td, L // cl),             # time chunks innermost
        in_specs=[
            pl.BlockSpec((1, cl, td), lambda b, d, t: (b, t, d)),        # u
            pl.BlockSpec((1, cl, dt_rank), lambda b, d, t: (b, t, 0)),   # dt (pre-proj)
            pl.BlockSpec((1, d_state, cl), lambda b, d, t: (b, 0, t)),   # B^T (S, time)
            pl.BlockSpec((1, d_state, cl), lambda b, d, t: (b, 0, t)),   # C^T (S, time)
            pl.BlockSpec((1, cl, td), lambda b, d, t: (b, t, d)),        # z
            pl.BlockSpec((dt_rank, td), lambda b, d, t: (0, d)),         # W_dt (bf16)
            pl.BlockSpec((1, td), lambda b, d, t: (0, d)),               # dt_bias
            pl.BlockSpec((d_state, td), lambda b, d, t: (0, d)),         # -exp(A_log)^T
            pl.BlockSpec((1, td), lambda b, d, t: (0, d)),               # D
        ],
        out_specs=pl.BlockSpec((1, cl, td), lambda b, d, t: (b, t, d)),
        scratch_shapes=[
            pltpu.VMEM((cl, td), jnp.float32),        # dt (post softplus) for the chunk
            pltpu.VMEM((cl, td), jnp.float32),        # dt * u
            pltpu.VMEM((cl, td), jnp.float32),        # y accumulator
            pltpu.VMEM((d_state, td), jnp.float32),   # running state (carried)
        ],
        compiler_params=pltpu.CompilerParams(
            dimension_semantics=("parallel", "parallel", "arbitrary"),
            vmem_limit_bytes=_VMEM_LIMIT),
    )(x, dt_in, b_t, c_t, z, w_dt, dt_bias, a_neg, d_skip)


# ----------------------------------------------------------------------- model wrapper
def init_params(key, d_model, n_layer, vocab_padded, d_inner, d_state, d_conv, dt_rank):
    keys = jax.random.split(key, 1 + n_layer)
    params = {
        "embedding": (jax.random.normal(keys[0], (vocab_padded, d_model), jnp.float32)
                      * 0.02).astype(jnp.bfloat16),
        "norm_f": jnp.ones((1, d_model), jnp.float32),
        "layers": [],
    }
    for i in range(n_layer):
        lk = jax.random.split(keys[1 + i], 10)
        layer = dict(
            norm_w=jnp.ones((1, d_model), jnp.float32),
            # in_proj split into x / z halves (fused in one matmul2 call).
            W_in_x=(jax.random.normal(lk[0], (d_model, d_inner), jnp.float32) * 0.02
                    ).astype(jnp.bfloat16),
            W_in_z=(jax.random.normal(lk[1], (d_model, d_inner), jnp.float32) * 0.02
                    ).astype(jnp.bfloat16),
            # conv weight layout: (d_conv, d_inner); PyTorch stores (d_inner, 1, d_conv).
            conv_w=jax.random.normal(lk[2], (d_conv, d_inner), jnp.float32) * 0.1,
            conv_b=jax.random.normal(lk[3], (1, d_inner), jnp.float32) * 0.1,
            # x_proj split into dt / B / C weights (bf16 operands for the MXU).
            W_x_dt=(jax.random.normal(lk[4], (d_inner, dt_rank), jnp.float32) * 0.02
                    ).astype(jnp.bfloat16),
            W_x_B=(jax.random.normal(lk[5], (d_inner, d_state), jnp.float32) * 0.02
                   ).astype(jnp.bfloat16),
            W_x_C=(jax.random.normal(lk[6], (d_inner, d_state), jnp.float32) * 0.02
                   ).astype(jnp.bfloat16),
            W_dt=(jax.random.normal(lk[7], (dt_rank, d_inner), jnp.float32) * 0.5
                  ).astype(jnp.bfloat16),
            dt_bias=jax.random.normal(lk[8], (1, d_inner), jnp.float32) * 0.1,
            # A = -exp(A_log) hoisted out of the kernel, stored transposed (S, d_inner).
            A_negT=-jnp.broadcast_to(
                jnp.arange(1, d_state + 1, dtype=jnp.float32)[:, None],
                (d_state, d_inner)),
            D=jnp.ones((1, d_inner), jnp.float32),
            W_out=(jax.random.normal(lk[9], (d_inner, d_model), jnp.float32) * 0.02
                   ).astype(jnp.bfloat16),
        )
        params["layers"].append(layer)
    return params


def mamba_mixer(normed, p, cfg):
    bsz, L, d_model = normed.shape
    d_inner, d_state, dt_rank = cfg["d_inner"], cfg["d_state"], cfg["dt_rank"]

    a2d = normed.reshape(bsz * L, d_model)
    # fused in_proj: activations read once for both x and z
    x2d, z2d = matmul2(a2d, p["W_in_x"], p["W_in_z"], jnp.bfloat16)
    x_pre = x2d.reshape(bsz, L, d_inner)
    z = z2d.reshape(bsz, L, d_inner)

    x_conv = conv1d_silu(x_pre, p["conv_w"], p["conv_b"])          # (B, L, d_inner) bf16

    # fused x_proj -> dt / B / C (no HBM slicing of a combined output)
    dt_in2d, b2d, c2d = xproj(x_conv.reshape(bsz * L, d_inner),
                              p["W_x_dt"], p["W_x_B"], p["W_x_C"])
    dt_in = dt_in2d.reshape(bsz, L, dt_rank)
    # small glue transposes so the scan sees (batch, d_state, L): d_state on sublanes
    b_t = jnp.swapaxes(b2d.reshape(bsz, L, d_state), 1, 2)
    c_t = jnp.swapaxes(c2d.reshape(bsz, L, d_state), 1, 2)

    # dt_proj + softplus fused inside ssm_scan.
    y = ssm_scan(x_conv, dt_in, b_t, c_t, z,
                 p["A_negT"], p["D"], p["dt_bias"], p["W_dt"])
    out = matmul(y.reshape(bsz * L, d_inner), p["W_out"], jnp.bfloat16)
    return out.reshape(bsz, L, d_model)


def forward(params, input_ids, cfg, num_last_tokens=0):
    bsz, L = input_ids.shape
    emb = params["embedding"]                            # (vocab_padded, d_model) bf16
    hidden = emb[input_ids]                              # embedding gather (glue)
    residual = jnp.zeros(hidden.shape, jnp.float32)      # first block: residual = None
    for p in params["layers"]:
        normed, residual = add_rmsnorm(hidden, residual, p["norm_w"], eps=cfg["eps"])
        hidden = mamba_mixer(normed, p, cfg)
    final, _ = add_rmsnorm(hidden, residual, params["norm_f"], eps=cfg["eps"])
    if num_last_tokens > 0:
        final = final[:, -num_last_tokens:]
    bf, lh, d_model = final.shape
    # tied lm_head: one-time transposed copy of the embedding (no in-kernel transpose).
    emb_t = emb.T                                        # (d_model, vocab_padded) glue
    logits = matmul(final.reshape(bf * lh, d_model), emb_t, jnp.float32)
    return {"logits": logits.reshape(bf, lh, -1), "hidden_states": final}


if __name__ == "__main__":
    # Small config consistent with the module's defaults (scaled down).
    d_model = 32
    n_layer = 2
    vocab_size = 100
    pad_vocab_size_multiple = 128   # lane-aligned lm_head output
    vocab_padded = ((vocab_size + pad_vocab_size_multiple - 1)
                    // pad_vocab_size_multiple) * pad_vocab_size_multiple
    expand, d_state, d_conv = 2, 16, 4
    d_inner = expand * d_model
    dt_rank = -(-d_model // 16)     # ceil(d_model / 16)
    cfg = dict(d_model=d_model, d_inner=d_inner, d_state=d_state,
               dt_rank=dt_rank, d_conv=d_conv, eps=1e-5)

    key = jax.random.PRNGKey(0)
    kp, kt = jax.random.split(key)
    params = init_params(kp, d_model, n_layer, vocab_padded, d_inner,
                         d_state, d_conv, dt_rank)

    B, L = 2, 8
    input_ids = jax.random.randint(kt, (B, L), 0, vocab_size)

    out = forward(params, input_ids, cfg, num_last_tokens=0)
    jax.block_until_ready(out["logits"])
    assert out["logits"].shape == (B, L, vocab_padded)
    assert out["hidden_states"].shape == (B, L, d_model)
    # TODO(synk): callers must mask logits columns >= vocab_size (padded tied vocab).
    print("KERNEL_OK")
</pallas_src>

<mosaic_0001>
module attributes {stable_mosaic.version = 11 : i64} {
  func.func @_add_rmsnorm_kernel(%arg0: i32, %arg1: i32, %arg2: memref<1x8x32xbf16, #tpu.memory_space<vmem>>, %arg3: memref<1x8x32xf32, #tpu.memory_space<vmem>>, %arg4: memref<1x32xf32, #tpu.memory_space<vmem>>, %arg5: memref<1x8x32xbf16, #tpu.memory_space<vmem>>, %arg6: memref<1x8x32xf32, #tpu.memory_space<vmem>>) attributes {dimension_semantics = [#tpu.dimension_semantics<parallel>, #tpu.dimension_semantics<parallel>], iteration_bounds = array<i64: 2, 1>, scalar_prefetch = 0 : i64, scratch_operands = 0 : i64, tpu.core_type = #tpu.core_type<tc>, window_params = [{transform_indices = @transform_0, window_bounds = array<i64: 1, 8, 32>}, {transform_indices = @transform_1, window_bounds = array<i64: 1, 8, 32>}, {pipeline_mode = #tpu.pipeline_mode<synchronous>, transform_indices = @transform_2, window_bounds = array<i64: 1, 32>}, {transform_indices = @transform_3, window_bounds = array<i64: 1, 8, 32>}, {transform_indices = @transform_4, window_bounds = array<i64: 1, 8, 32>}]} {
    %c0 = arith.constant 0 : index
    %c0_0 = arith.constant 0 : index
    %c0_1 = arith.constant 0 : index
    %0 = vector.load %arg2[%c0, %c0_0, %c0_1] : memref<1x8x32xbf16, #tpu.memory_space<vmem>>, vector<1x8x32xbf16>
    %1 = vector.shape_cast %0 : vector<1x8x32xbf16> to vector<8x32xbf16>
    %2 = arith.extf %1 : vector<8x32xbf16> to vector<8x32xf32>
    %c0_2 = arith.constant 0 : index
    %c0_3 = arith.constant 0 : index
    %c0_4 = arith.constant 0 : index
    %3 = vector.load %arg3[%c0_2, %c0_3, %c0_4] : memref<1x8x32xf32, #tpu.memory_space<vmem>>, vector<1x8x32xf32>
    %4 = vector.shape_cast %3 : vector<1x8x32xf32> to vector<8x32xf32>
    %5 = arith.addf %2, %4 : vector<8x32xf32>
    %6 = arith.mulf %5, %5 : vector<8x32xf32>
    %cst = arith.constant dense<0.000000e+00> : vector<8xf32>
    %7 = vector.multi_reduction <add>, %6, %cst [1] : vector<8x32xf32> to vector<8xf32>
    %8 = vector.shape_cast %7 : vector<8xf32> to vector<8x1xf32>
    %cst_5 = arith.constant 3.200000e+01 : f32
    %9 = vector.broadcast %cst_5 : f32 to vector<8x1xf32>
    %10 = arith.divf %8, %9 : vector<8x1xf32>
    %cst_6 = arith.constant 9.99999974E-6 : f32
    %11 = vector.broadcast %cst_6 : f32 to vector<8x1xf32>
    %12 = arith.addf %10, %11 : vector<8x1xf32>
    %13 = math.rsqrt %12 : vector<8x1xf32>
    %14 = vector.broadcast %13 : vector<8x1xf32> to vector<8x32xf32>
    %15 = arith.mulf %5, %14 : vector<8x32xf32>
    %c0_7 = arith.constant 0 : index
    %c0_8 = arith.constant 0 : index
    %16 = vector.load %arg4[%c0_7, %c0_8] : memref<1x32xf32, #tpu.memory_space<vmem>>, vector<1x32xf32>
    %17 = vector.broadcast %16 : vector<1x32xf32> to vector<8x32xf32>
    %18 = arith.mulf %15, %17 : vector<8x32xf32>
    %19 = arith.truncf %18 : vector<8x32xf32> to vector<8x32xbf16>
    %c0_9 = arith.constant 0 : index
    %c0_10 = arith.constant 0 : index
    %c0_11 = arith.constant 0 : index
    %20 = vector.load %arg5[%c0_9, %c0_10, %c0_11] : memref<1x8x32xbf16, #tpu.memory_space<vmem>>, vector<1x8x32xbf16>
    %21 = vector.shape_cast %20 : vector<1x8x32xbf16> to vector<8x32xbf16>
    %22 = vector.shape_cast %19 : vector<8x32xbf16> to vector<1x8x32xbf16>
    tpu.vector_store %arg5[%c0_9, %c0_10, %c0_11], %22 {strides = array<i32>} : memref<1x8x32xbf16, #tpu.memory_space<vmem>>, vector<1x8x32xbf16>,
    %c0_12 = arith.constant 0 : index
    %c0_13 = arith.constant 0 : index
    %c0_14 = arith.constant 0 : index
    %23 = vector.load %arg6[%c0_12, %c0_13, %c0_14] : memref<1x8x32xf32, #tpu.memory_space<vmem>>, vector<1x8x32xf32>
    %24 = vector.shape_cast %23 : vector<1x8x32xf32> to vector<8x32xf32>
    %25 = vector.shape_cast %5 : vector<8x32xf32> to vector<1x8x32xf32>
    tpu.vector_store %arg6[%c0_12, %c0_13, %c0_14], %25 {strides = array<i32>} : memref<1x8x32xf32, #tpu.memory_space<vmem>>, vector<1x8x32xf32>,
    return
  }
  func.func @transform_0(%arg0: i32, %arg1: i32) -> (i32, i32, i32) {
    %c0_i32 = arith.constant 0 : i32
    %c0_i32_0 = arith.constant 0 : i32
    return %arg0, %arg1, %c0_i32 : i32, i32, i32
  }
  func.func @transform_1(%arg0: i32, %arg1: i32) -> (i32, i32, i32) {
    %c0_i32 = arith.constant 0 : i32
    %c0_i32_0 = arith.constant 0 : i32
    return %arg0, %arg1, %c0_i32 : i32, i32, i32
  }
  func.func @transform_2(%arg0: i32, %arg1: i32) -> (i32, i32) {
    %c0_i32 = arith.constant 0 : i32
    %c0_i32_0 = arith.constant 0 : i32
    %c0_i32_1 = arith.constant 0 : i32
    return %c0_i32, %c0_i32_0 : i32, i32
  }
  func.func @transform_3(%arg0: i32, %arg1: i32) -> (i32, i32, i32) {
    %c0_i32 = arith.constant 0 : i32
    %c0_i32_0 = arith.constant 0 : i32
    return %arg0, %arg1, %c0_i32 : i32, i32, i32
  }
  func.func @transform_4(%arg0: i32, %arg1: i32) -> (i32, i32, i32) {
    %c0_i32 = arith.constant 0 : i32
    %c0_i32_0 = arith.constant 0 : i32
    return %arg0, %arg1, %c0_i32 : i32, i32, i32
  }
}

</mosaic_0001>

<bundles_post_ra>
// kernel: tpu_custom_call.1
= control target key start
LH: loop header
LB: loop body
LE: loop exit
PB: predicated region body
PF: predicated region fallthrough
CT: control target
= control target key end

     0   :  { %10 = vsyncpa [#allocation3], 0  ;;  %s963_s0 = inlined_call_operand.hbm [shape: bf16[2,8,32], index: 0, kind: input, shape index: {}]   ;;  %s964_s1 = inlined_call_operand.hbm [shape: f32[2,8,32], index: 1, kind: input, shape index: {}]   ;;  %s965_s2 = inlined_call_operand.vmem [shape: f32[1,32], index: 2, kind: input, shape index: {}]   ;;  %s966_s3 = inlined_call_operand.hbm [shape: bf16[2,8,32], index: 3, kind: output, shape index: {0}]   ;;  %s967_s4 = inlined_call_operand.hbm [shape: f32[2,8,32], index: 4, kind: output, shape index: {1}]  }
   0x1   :  { %12 = vsyncpa [#allocation3 + $0x1], 0 }
   0x2   :  { %13 = vsyncpa [#allocation6], 0 }
   0x3   :  { %15 = vsyncpa [#allocation6 + $0x1], 0 }
   0x4   :  { %16 = vsyncpa [#allocation4], 0 }
   0x5   :  { %18 = vsyncpa [#allocation4 + $0x1], 0 }
   0x6   :  { %19 = vsyncpa [#allocation9], 0 }
   0x7   :  { %21 = vsyncpa [#allocation9 + $0x1], 0  ;;  %s775_s15 = smov 0   ;;  %s777_s16 = smov 0  }
   0x8   :  { %s779_s17 = smov 0   ;;  %s781_s18 = smov 0  }
   0x9   :  { %s783_s19 = smov 0   ;;  %s785_s20 = smov 0  }
   0xa LB: > { %s480_s21 = sadd.s32 4294967295, %s744_s20   ;;  %s481_s22 = sadd.s32 4294967294, %s744_s20   ;;  %s744_s20 = sphi %s785_s20, %s27_s20   ;;  %s740_s19 = sphi %s783_s19, %s979_s19   ;;  %s736_s18 = sphi %s781_s18, %s978_s18   ;;  %s732_s17 = sphi %s779_s17, %s977_s17   ;;  %s728_s16 = sphi %s777_s16, %s976_s16   ;;  %s724_s15 = sphi %s775_s15, %s975_s15  }
   0xb   : > { %s39_s23 = sadd.s32 1, %s740_s19  ;;  %s48_s24 = sadd.s32 1, %s732_s17 }
   0xc   : > { %p41_p0 = scmp.ge.s32.totalorder %s39_s23, 2  ;;  %p55_p1 = scmp.ne.s32.totalorder %s732_s17, %s728_s16 }
   0xd   : > { %p56_p2 = scmp.eq.s32.totalorder %s744_s20, 0  ;;  %p61_p3 = scmp.ne.s32.totalorder %s728_s16, %s724_s15 }
   0xe   : > { %s981_s23 = smov (%p41_p0, %s39_s23), 0  ;;  %p62_p5 = scmp.eq.s32.totalorder %s480_s21, 0 }
   0xf   : > { %p816_p4 = por %p56_p2, %p55_p1  ;;  %s43_s26 = ssub.s32 %s740_s19, %s981_s23 }
  0x10   : > { %p136_p6 = scmp.eq.s32.totalorder %s480_s21, 1  ;;  %p46_p7 = scmp.eq.s32.totalorder %s43_s26, 0 }
  0x11   : > { %p822_p8 = por %p62_p5, %p61_p3  ;;  %p142_p10 = scmp.eq.s32.totalorder %s481_s22, 1 }
  0x12   : > { %p826_p9 = por %p136_p6, %p55_p1  ;;  %p522_p13 = scmp.lt.s32.totalorder %s744_s20, 2 }
  0x13   : > { %s831_s29 = scalar_select %p46_p7, %s732_s17, %s48_s24  }
  0x14   : > { %p833_p11 = por %p142_p10, %p61_p3  ;;  %s840_s5 = sand.u32 1, %s732_s17  }
  0x15   : > { %s484_s6 = sshll.u32 %s840_s5, 2  ;;  %s485_s7 = sshll.u32 %s740_s19, 6 }
  0x16   : > { %s203_s10 = scalar_lea.hbm %s963_s0, %s485_s7  ;;  %s197_s11 = scalar_lea.vmem [#allocation2], %s484_s6 }
  0x17   : > { %s205_s12 = sshll.u32 %s197_s11, 4  ;;  %p849_p0 = pnand %p522_p13, %p816_p4  ;;  %s206_s12 = int_to_ptr.vmem [resolvable:$true] %s205_s12 }
  0x18   : > { %p488_p1 = scmp.ge.s32.totalorder %s744_s20, 1  ;;  %p229_p2 = scmp.lt.s32.totalorder %s744_s20, 3 }
  0x19   : > { %s194_s14 = scalar_lea.sflag [#allocation3], %s840_s5  ;;  %p576_p3 = pneg %p849_p0 }
  0x1a   : > { %s587_s21 = scalar_lea.vmem %s206_s12, 64  ;;  %s746_s22 = smov [#allocation2]  }
  0x1b   : > { %p588_p5 = scmp.ne.s32.totalorder %s206_s12, %s587_s21  ;;  %s592_s24 = sshll.u32 %s746_s22, 4  ;;  %s593_s24 = int_to_ptr.vmem [resolvable:$false] %s592_s24 }
  0x1c   : > { %s594_s25 = scalar_lea.vmem %s593_s24, 128  ;;  %p595_p4 = scmp.lt.s32.totalorder %s206_s12, %s593_s24 }
  0x1d   : > { %p590_p6 = pnand %p588_p5, %p576_p3  ;;  %p596_p10 = scmp.lt.s32.totalorder %s594_s25, %s587_s21 }
  0x1f   : > { %p591_p7 = pneg %p590_p6  ;;  %p597_p13 = por %p596_p10, %p595_p4 }
  0x21   : > { %p598_p12 = pnand %p597_p13, %p591_p7 }
  0x23   : > { %601 = shalt.err (!%p598_p12)
}
  0x24   : > { %511 = dma.hbm_to_vmem [thread:$0]  (!%p849_p0), %s203_s10, 64, %s206_s12, %s194_s14  }
  0x25   : > { %p867_p5 = pnand %p488_p1, %p229_p2  ;;  %s486_s6 = sshll.u32 %s840_s5, 3 }
  0x26   : > { %s487_s7 = sshll.u32 %s740_s19, 7  ;;  %s216_s21 = scalar_lea.vmem [#allocation5], %s486_s6 }
  0x27   : > { %s222_s11 = scalar_lea.hbm %s964_s1, %s487_s7  ;;  %s224_s22 = sshll.u32 %s216_s21, 4  ;;  %s225_s22 = int_to_ptr.vmem [resolvable:$true] %s224_s22 }
  0x28   : > { %s213_s24 = scalar_lea.sflag [#allocation6], %s840_s5  ;;  %s615_s25 = scalar_lea.vmem %s225_s22, 128 }
  0x29   : > { %p616_p12 = scmp.ne.s32.totalorder %s225_s22, %s615_s25  ;;  %s747_s10 = smov [#allocation5]  }
  0x2a   : > { %s620_s12 = sshll.u32 %s747_s10, 4  ;;  %s621_s12 = int_to_ptr.vmem [resolvable:$false] %s620_s12 }
  0x2b   : > { %p618_p6 = pnand %p616_p12, %p576_p3  ;;  %s622_s14 = scalar_lea.vmem %s621_s12, 256 }
  0x2c   : > { %p623_p1 = scmp.lt.s32.totalorder %s225_s22, %s621_s12  ;;  %p624_p2 = scmp.lt.s32.totalorder %s622_s14, %s615_s25 }
  0x2d   : > { %p619_p7 = pneg %p618_p6 }
  0x2e   : > { %p625_p4 = por %p624_p2, %p623_p1 }
  0x30   : > { %p626_p10 = pnand %p625_p4, %p619_p7 }
  0x32   : > { %629 = shalt.err (!%p626_p10)
}
  0x33   : > { %514 = dma.hbm_to_vmem [thread:$0]  (!%p849_p0), %s222_s11, 128, %s225_s22, %s213_s24  }
  0x34   : > { %233 = sbr.rel (%p867_p5) target bundleno = 244 (0xf4), region = 32  ;;  %s885_s5 = sand.u32 (!%p867_p5), 1, %s728_s16  }
  0x35   : > { %s489_s6 = sshll.u32 (!%p867_p5), %s885_s5, 2  ;;  %s236_s7 = scalar_lea.sflag (!%p867_p5), [#allocation3], %s885_s5 }
  0x36   : > { %s239_s8 = scalar_lea.vmem (!%p867_p5), [#allocation2], %s489_s6 }
  0x39   : > { %707 = dma.done.wait (%p822_p8), %s236_s7, 64  }
  0x3a   : > { %709 = vsyncadd (%p822_p8), %s236_s7, 4294967232  ;;  %s490_s13 = sshll.u32 %s885_s5, 3  ;;  %s245_s26 = scalar_lea.sflag [#allocation6], %s885_s5 }
  0x3b   : > { %s248_s9 = scalar_lea.vmem [#allocation5], %s490_s13 }
  0x3c   : > { %711 = dma.done.wait (%p822_p8), %s245_s26, 128  }
  0x3d   : > { %713 = vsyncadd (%p822_p8), %s245_s26, 4294967168  ;;  %v283_v0 = vld [vmem:[%s239_s8] sm:$0xf]  ;;  %v285_v1 = vld [vmem:[%s248_s9] sm:$0xff]  ;;  %vm288_vm0 = vcmask 261120   ;;  %s282_s11 = scalar_lea.vmem [#allocation8], %s490_s13 }
  0x3e   : > { %v284_v2 = vunpack.c.l.bf16 %v283_v0  ;;  %s497_s21 = sshll.u32 %s736_s18, 7  ;;  %s343_s22 = sshll.u32 %s282_s11, 4  ;;  %s344_s22 = int_to_ptr.vmem [resolvable:$true] %s343_s22 }
  0x3f   : > { %s341_s27 = scalar_lea.hbm %s967_s4, %s497_s21  ;;  %s315_s10 = scalar_lea.sflag [#allocation9], %s885_s5 }
  0x40   : > { %v286_v3 = vadd.f32 %v285_v1, %v284_v2  ;;  %s630_s12 = scalar_lea.vmem %s344_s22, 128  ;;  %s748_s14 = smov [#allocation8]  }
  0x41   : > { %p631_p8 = scmp.ne.s32.totalorder %s344_s22, %s630_s12  ;;  %s634_s7 = sshll.u32 %s748_s14, 4  ;;  %s635_s7 = int_to_ptr.vmem [resolvable:$false] %s634_s7 }
  0x42   : > { %v287_v4 = vmul.f32 %v286_v3, %v286_v3  ;;  %308 = vst.msk [vmem:[%s282_s11] sm:$0xff] %vm288_vm0, %v286_v3  ;;  %s636_s8 = scalar_lea.vmem %s635_s7, 256  ;;  %p637_p13 = scmp.lt.s32.totalorder %s344_s22, %s635_s7 }
  0x43   : > { %p632_p0 = pnand %p631_p8, %p826_p9  ;;  %p638_p5 = scmp.lt.s32.totalorder %s636_s8, %s630_s12 }
  0x44   : > { %v289_v5 = vsel %vm288_vm0, %v287_v4, 0.0 }
  0x45   : > { %290 = vadd.xlane.f32.xlu0 %v289_v5  ;;  %p633_p3 = pneg %p632_p0  ;;  %p639_p12 = por %p638_p5, %p637_p13 }
  0x47   : > { %p640_p6 = pnand %p639_p12, %p633_p3 }
  0x49   : > { %643 = shalt.err (!%p640_p6)
}
  0x4a   : > { %s644_s13 = scalar_lea.hbm %s341_s27, 128  ;;  %s648_s11 = scalar_lea.hbm %s967_s4, 256 }
  0x4b   : > { %p645_p7 = scmp.ne.s32.totalorder %s341_s27, %s644_s13  ;;  %p649_p4 = scmp.lt.s32.totalorder %s341_s27, %s967_s4 }
  0x4c   : > { %p650_p10 = scmp.lt.s32.totalorder %s648_s11, %s644_s13 }
  0x4d   : > { %p646_p1 = pnand %p645_p7, %p826_p9 }
  0x4e   : > { %p651_p8 = por %p650_p10, %p649_p4 }
  0x4f   : > { %p647_p2 = pneg %p646_p1 }
  0x51   : > { %p652_p0 = pnand %p651_p8, %p647_p2 }
  0x53   : > { %655 = shalt.err (!%p652_p0)
}
  0x54   : > { %505 = dma.vmem_to_hbm [thread:$0]  (%p826_p9), %s344_s22, 128, %s341_s27, %s315_s10   ;;  %v493_v10 = vld [vmem:[%s965_s2] ss:$0 sm:$0xff]  ;;  %vm306_vm1 = vcmask 257024  }
  0x55   : > { %s496_s14 = sshll.u32 %s736_s18, 6  ;;  %s275_s7 = scalar_lea.vmem [#allocation7], %s489_s6 }
  0x56   : > { %s329_s8 = sshll.u32 %s275_s7, 4  ;;  %s327_s10 = scalar_lea.hbm %s966_s3, %s496_s14  ;;  %s330_s8 = int_to_ptr.vmem [resolvable:$true] %s329_s8 }
  0x57   : > { %s310_s13 = scalar_lea.sflag [#allocation4], %s885_s5  ;;  %s656_s26 = scalar_lea.vmem %s330_s8, 64 }
  0x58   : > { %p657_p3 = scmp.ne.s32.totalorder %s330_s8, %s656_s26  ;;  %s749_s9 = smov [#allocation7]  }
  0x59   : > { %s660_s18 = sshll.u32 %s749_s9, 4  ;;  %s661_s18 = int_to_ptr.vmem [resolvable:$false] %s660_s18 }
  0x5a   : > { %p658_p13 = pnand %p657_p3, %p826_p9  ;;  %s662_s6 = scalar_lea.vmem %s661_s18, 128 }
  0x5b   : > { %p663_p12 = scmp.lt.s32.totalorder %s330_s8, %s661_s18  ;;  %p664_p6 = scmp.lt.s32.totalorder %s662_s6, %s656_s26 }
  0x5c   : > { %p659_p5 = pneg %p658_p13 }
  0x5d   : > { %p665_p7 = por %p664_p6, %p663_p12 }
  0x5f   : > { %p666_p1 = pnand %p665_p7, %p659_p5 }
  0xce   : > { %v291_v6 = vpop.xlane.xlu0 %290 }
  0xcf   : > { %v293_v7 = vmul.f32 0.03125, %v291_v6 }
  0xd1   : > { %v294_v8 = vadd.f32 1e-05, %v293_v7 }
  0xd3   : > { %572 = vrsqrt.f32 %v294_v8 }
  0xe0   : > { %v573_v9 = vpop.eup %572 }
  0xe1   : > { %v296_v11 = vmul.f32 %v573_v9, %v286_v3 }
  0xe3   : > { %v304_v12 = vmul.f32 %v493_v10, %v296_v11 }
  0xe5   : > { %v305_v13 = vpack.c.bf16 %v304_v12, %v304_v12 }
  0xe7   : > { %307 = vst.msk [vmem:[%s275_s7] sm:$0xf] %vm306_vm1, %v305_v13 }
  0xe8   : > { %669 = shalt.err (!%p666_p1)
}
  0xe9   : > { %s670_s11 = scalar_lea.hbm %s327_s10, 64  ;;  %s674_s24 = scalar_lea.hbm %s966_s3, 128 }
  0xea   : > { %p671_p2 = scmp.ne.s32.totalorder %s327_s10, %s670_s11  ;;  %p675_p8 = scmp.lt.s32.totalorder %s327_s10, %s966_s3 }
  0xeb   : > { %p676_p0 = scmp.lt.s32.totalorder %s674_s24, %s670_s11 }
  0xec   : > { %p672_p4 = pnand %p671_p2, %p826_p9 }
  0xed   : > { %p677_p3 = por %p676_p0, %p675_p8 }
  0xee   : > { %p673_p10 = pneg %p672_p4 }
  0xf0   : > { %p678_p13 = pnand %p677_p3, %p673_p10 }
  0xf2   : > { %681 = shalt.err (!%p678_p13)
}
  0xf3   : > { %504 = dma.vmem_to_hbm [thread:$0]  (%p826_p9), %s330_s8, 64, %s327_s10, %s310_s13  }
  0xf4 PF: > { %s355_s14 = sand.u32 1, %s724_s15   ;;  %p974_p5 = scmp.ge.s32.totalorder %s744_s20, 2 }
  0xf5   : > { %s356_s7 = scalar_lea.sflag [#allocation4], %s355_s14 }
  0xf6   : > { %p516_p12 = pnand %p974_p5, %p833_p11 }
  0xf8   : > { %p517_p6 = pneg %p516_p12 }
  0xfa   : > { %715 = dma.done.wait (%p517_p6), %s356_s7, 64  }
  0xfb   : > { %717 = vsyncadd (%p517_p6), %s356_s7, 4294967232  ;;  %s365_s22 = scalar_lea.sflag [#allocation9], %s355_s14 }
  0xfc   : > { %719 = dma.done.wait (%p517_p6), %s365_s22, 128  }
  0xfd   : > { %721 = vsyncadd (%p517_p6), %s365_s22, 4294967168  ;;  %s27_s20 = sadd.s32 1, %s744_s20   ;;  %s975_s15 = smov %s728_s16 }
  0xfe   : > { %p24_p7 = scmp.ge.s32.totalorder %s27_s20, 4   ;;  %s976_s16 = smov %s732_s17 }
  0xff   : > { %s977_s17 = smov %s831_s29  ;;  %s978_s18 = smov %s740_s19 }
 0x100   : > { %s979_s19 = smov %s981_s23  ;;  %26 = sbr.rel (!%p24_p7) target bundleno = 10 (0xa), region = 107 }
 0x105   :  { %370 = vsyncpa [#allocation3], 1 }
 0x106   :  { %372 = vsyncpa [#allocation3 + $0x1], 1 }
 0x107   :  { %373 = vsyncpa [#allocation6], 1 }
 0x108   :  { %375 = vsyncpa [#allocation6 + $0x1], 1 }
 0x109   :  { %376 = vsyncpa [#allocation4], 1 }
 0x10a   :  { %378 = vsyncpa [#allocation4 + $0x1], 1 }
 0x10b   :  { %379 = vsyncpa [#allocation9], 1 }
 0x10c   :  { %381 = vsyncpa [#allocation9 + $0x1], 1 }

</bundles_post_ra>
